<compile_context>
chip_gen: v6e
topology: v6e:2x2x1
jax: 0.10.0
libtpu: 0.0.40
codegen_flags: <defaults>
</compile_context>

<pallas_src>
import jax
import jax.numpy as jnp
from jax.experimental import pallas as pl
from jax.experimental.pallas import tpu as pltpu

_LANE = 128  # TPU lane width (for VMEM-footprint sizing only)


def _cdiv(a, b):
    return -(-a // b)


def _rescale_kernel(scale_ref, x_ref, o_ref):
    # scale_ref: SMEM (3,) float32 — per-channel scales (scalar-prefetched).
    # x_ref / o_ref: VMEM (1, TH, W) tile of the current channel's plane.
    c = pl.program_id(0)
    o_ref[...] = (x_ref[...] * scale_ref[c]).astype(o_ref.dtype)


def random_color_rescale(
    img,
    key,
    r=(0.0, 1.0),
    g=(0.0, 1.0),
    b=(0.0, 1.0),
    *,
    block_rows=None,                # optional cap on rows per tile
    target_block_bytes=512 * 1024,  # ~512 KiB per block (2 MiB with dbl-buf)
):
    """Pallas equivalent of RandomColorRescale.forward.

    img: (3, H, W) array (CHW layout).
    key: jax PRNG key (stands in for torch.rand's global RNG state).
    """
    C, H, W = img.shape
    assert C == 3, "RandomColorRescale expects 3 color channels"

    # rand = torch.rand(3); rand[i] = rand[i] * (hi - lo) + lo
    u = jax.random.uniform(key, (3,), dtype=jnp.float32)
    lo = jnp.array([r[0], g[0], b[0]], dtype=jnp.float32)
    hi = jnp.array([r[1], g[1], b[1]], dtype=jnp.float32)
    scales = u * (hi - lo) + lo  # (3,)

    # --- Row-tile sizing -----------------------------------------------------
    itemsize = jnp.dtype(img.dtype).itemsize
    sub = max(8, 32 // itemsize)            # sublane tile: 8 f32 / 16 bf16 / 32 i8
    vmem_row_bytes = _cdiv(W, _LANE) * _LANE * itemsize  # lane-padded VMEM row
    th = target_block_bytes // max(1, vmem_row_bytes)
    if block_rows is not None:
        th = min(th, block_rows)
    th = (th // sub) * sub                  # keep second-to-last dim sublane-aligned
    if th <= 0 or th >= H:
        th = H                              # full-extent block is always legal
    n_tiles = _cdiv(H, th)                  # ragged last tile handled by Pallas

    return pl.pallas_call(
        _rescale_kernel,
        out_shape=jax.ShapeDtypeStruct((C, H, W), img.dtype),
        grid_spec=pltpu.PrefetchScalarGridSpec(
            num_scalar_prefetch=1,
            grid=(C, n_tiles),
            in_specs=[
                pl.BlockSpec((1, th, W), lambda c, t, scales_ref: (c, t, 0)),
            ],
            out_specs=pl.BlockSpec((1, th, W), lambda c, t, scales_ref: (c, t, 0)),
        ),
        compiler_params=pltpu.CompilerParams(
            dimension_semantics=("parallel", "parallel"),
        ),
    )(scales, img)


if __name__ == "__main__":
    key = jax.random.PRNGKey(0)
    k_img, k_rand1, k_rand2, k_rand3 = jax.random.split(key, 4)

    def ref_rescale(img, k, r=(0.0, 1.0), g=(0.0, 1.0), b=(0.0, 1.0)):
        u = jax.random.uniform(k, (3,), dtype=jnp.float32)
        lo = jnp.array([r[0], g[0], b[0]], dtype=jnp.float32)
        hi = jnp.array([r[1], g[1], b[1]], dtype=jnp.float32)
        s = u * (hi - lo) + lo
        return img * s[:, None, None]

    # Case 1: small square image, custom per-channel ranges.
    C, H, W = 3, 16, 16
    img = jax.random.uniform(k_img, (C, H, W), dtype=jnp.float32)
    out = random_color_rescale(img, k_rand1, r=(0.2, 0.8), g=(0.0, 1.0), b=(0.5, 1.5))
    out = jax.block_until_ready(out)
    ref = ref_rescale(img, k_rand1, r=(0.2, 0.8), g=(0.0, 1.0), b=(0.5, 1.5))
    assert jnp.allclose(out, ref, atol=1e-6), "mismatch vs reference (case 1)"

    # Case 2: width not a multiple of 128 (masked lane tail inside the kernel).
    H2, W2 = 24, 40
    img2 = jax.random.uniform(k_img, (C, H2, W2), dtype=jnp.float32)
    out2 = jax.block_until_ready(random_color_rescale(img2, k_rand2))
    ref2 = ref_rescale(img2, k_rand2)
    assert jnp.allclose(out2, ref2, atol=1e-6), "mismatch vs reference (case 2)"

    # Case 3: forced small row tiles -> multi-tile grid with a ragged last tile.
    H3, W3 = 40, 160
    img3 = jax.random.uniform(k_img, (C, H3, W3), dtype=jnp.float32)
    out3 = jax.block_until_ready(
        random_color_rescale(img3, k_rand3, r=(0.1, 0.9), block_rows=16)
    )
    ref3 = ref_rescale(img3, k_rand3, r=(0.1, 0.9))
    assert jnp.allclose(out3, ref3, atol=1e-6), "mismatch vs reference (case 3)"

    print("KERNEL_OK")
</pallas_src>

<mosaic_0001>
module attributes {stable_mosaic.version = 11 : i64} {
  func.func @_rescale_kernel(%arg0: i32, %arg1: i32, %arg2: memref<3xf32, #tpu.memory_space<smem>>, %arg3: memref<1x16x16xf32, #tpu.memory_space<vmem>>, %arg4: memref<1x16x16xf32, #tpu.memory_space<vmem>>) attributes {dimension_semantics = [#tpu.dimension_semantics<parallel>, #tpu.dimension_semantics<parallel>], iteration_bounds = array<i64: 3, 1>, scalar_prefetch = 1 : i64, scratch_operands = 0 : i64, tpu.core_type = #tpu.core_type<tc>, window_params = [{transform_indices = @transform_0, window_bounds = array<i64: 1, 16, 16>}, {transform_indices = @transform_1, window_bounds = array<i64: 1, 16, 16>}]} {
    %c0 = arith.constant 0 : index
    %c0_0 = arith.constant 0 : index
    %c0_1 = arith.constant 0 : index
    %0 = vector.load %arg3[%c0, %c0_0, %c0_1] : memref<1x16x16xf32, #tpu.memory_space<vmem>>, vector<1x16x16xf32>
    %1 = arith.index_cast %arg0 : i32 to index
    %2 = memref.load %arg2[%1] : memref<3xf32, #tpu.memory_space<smem>>
    %3 = vector.broadcast %2 : f32 to vector<1x16x16xf32>
    %4 = arith.mulf %0, %3 : vector<1x16x16xf32>
    %c0_2 = arith.constant 0 : index
    %c0_3 = arith.constant 0 : index
    %c0_4 = arith.constant 0 : index
    %5 = vector.load %arg4[%c0_2, %c0_3, %c0_4] : memref<1x16x16xf32, #tpu.memory_space<vmem>>, vector<1x16x16xf32>
    tpu.vector_store %arg4[%c0_2, %c0_3, %c0_4], %4 {strides = array<i32>} : memref<1x16x16xf32, #tpu.memory_space<vmem>>, vector<1x16x16xf32>,
    return
  }
  func.func @transform_0(%arg0: i32, %arg1: i32, %arg2: memref<3xf32, #tpu.memory_space<smem>>) -> (i32, i32, i32) {
    %c0_i32 = arith.constant 0 : i32
    %c0_i32_0 = arith.constant 0 : i32
    return %arg0, %arg1, %c0_i32 : i32, i32, i32
  }
  func.func @transform_1(%arg0: i32, %arg1: i32, %arg2: memref<3xf32, #tpu.memory_space<smem>>) -> (i32, i32, i32) {
    %c0_i32 = arith.constant 0 : i32
    %c0_i32_0 = arith.constant 0 : i32
    return %arg0, %arg1, %c0_i32 : i32, i32, i32
  }
}

</mosaic_0001>

<bundles_post_ra>
// kernel: tpu_custom_call.1
= control target key start
LH: loop header
LB: loop body
LE: loop exit
PB: predicated region body
PF: predicated region fallthrough
CT: control target
= control target key end

     0   :  { %s476_s9 = smov [#allocation3]   ;;  %s646_s0 = inlined_call_operand.hbm [shape: f32[3], index: 0, kind: input, shape index: {}]   ;;  %s647_s1 = inlined_call_operand.hbm [shape: f32[3,16,16], index: 1, kind: input, shape index: {}]   ;;  %s648_s2 = inlined_call_operand.hbm [shape: f32[3,16,16], index: 2, kind: output, shape index: {}]  }
   0x1   :  { %8 = dma.hbm_to_smem %s646_s0, 16, %s476_s9, [#allocation2] }
   0x2   :  { %442 = dma.done.wait [#allocation2], 16 }
   0x3   :  { %443 = vsyncadd [#allocation2], 4294967280 }
   0x4   :  { %10 = sfence }
   0x5   :  { %11 = vsyncpa [#allocation5], 0 }
   0x6   :  { %13 = vsyncpa [#allocation5 + $0x1], 0 }
   0x7   :  { %14 = vsyncpa [#allocation6], 0 }
   0x8   :  { %16 = vsyncpa [#allocation6 + $0x1], 0  ;;  %s501_s12 = smov 0   ;;  %s503_s13 = smov 0  }
   0x9   :  { %s505_s14 = smov 0   ;;  %s507_s15 = smov 0  }
   0xa   :  { %s509_s16 = smov 0   ;;  %s511_s17 = smov 0  }
   0xb LB: > { %s272_s0 = sadd.s32 4294967295, %s474_s17   ;;  %s273_s18 = sadd.s32 4294967294, %s474_s17   ;;  %s474_s17 = sphi %s511_s17, %s22_s17   ;;  %s470_s16 = sphi %s509_s16, %s658_s16   ;;  %s466_s15 = sphi %s507_s15, %s657_s15   ;;  %s462_s14 = sphi %s505_s14, %s656_s14   ;;  %s458_s13 = sphi %s503_s13, %s655_s13   ;;  %s454_s12 = sphi %s501_s12, %s654_s12  }
   0xc   : > { %s34_s19 = sadd.s32 1, %s470_s16  ;;  %s43_s20 = sadd.s32 1, %s462_s14 }
   0xd   : > { %p36_p0 = scmp.ge.s32.totalorder %s34_s19, 3  ;;  %p50_p1 = scmp.ne.s32.totalorder %s462_s14, %s458_s13 }
   0xe   : > { %p51_p2 = scmp.eq.s32.totalorder %s474_s17, 0  ;;  %p56_p3 = scmp.ne.s32.totalorder %s458_s13, %s454_s12 }
   0xf   : > { %s660_s19 = smov (%p36_p0, %s34_s19), 0  ;;  %p57_p5 = scmp.eq.s32.totalorder %s272_s0, 0 }
  0x10   : > { %p542_p4 = por %p51_p2, %p50_p1  ;;  %s38_s22 = ssub.s32 %s470_s16, %s660_s19 }
  0x11   : > { %p82_p6 = scmp.eq.s32.totalorder %s272_s0, 2  ;;  %p41_p7 = scmp.eq.s32.totalorder %s38_s22, 0 }
  0x12   : > { %p548_p8 = por %p57_p5, %p56_p3  ;;  %p88_p10 = scmp.eq.s32.totalorder %s273_s18, 2 }
  0x13   : > { %p552_p9 = por %p82_p6, %p50_p1  ;;  %p301_p12 = scmp.lt.s32.totalorder %s474_s17, 3 }
  0x14   : > { %s557_s25 = scalar_select %p41_p7, %s462_s14, %s43_s20  }
  0x15   : > { %p559_p11 = por %p88_p10, %p56_p3  ;;  %s108_s27 = sand.u32 1, %s462_s14  }
  0x16   : > { %s276_s28 = sshll.u32 %s108_s27, 4  ;;  %s287_s29 = sshll.u32 %s470_s16, 8 }
  0x17   : > { %s120_s4 = scalar_lea.hbm %s647_s1, %s287_s29  ;;  %s112_s5 = scalar_lea.vmem [#allocation4], %s276_s28 }
  0x18   : > { %s121_s6 = sshll.u32 %s112_s5, 4  ;;  %p571_p13 = pnand %p301_p12, %p542_p4  ;;  %s122_s6 = int_to_ptr.vmem [resolvable:$true] %s121_s6 }
  0x19   : > { %p279_p0 = scmp.ge.s32.totalorder %s474_s17, 1  ;;  %s109_s8 = scalar_lea.sflag [#allocation5], %s108_s27 }
  0x1a   : > { %p366_p1 = pneg %p571_p13  ;;  %s377_s9 = scalar_lea.vmem %s122_s6, 256 }
  0x1b   : > { %p378_p2 = scmp.ne.s32.totalorder %s122_s6, %s377_s9  ;;  %s477_s10 = smov [#allocation4]  }
  0x1c   : > { %s382_s11 = sshll.u32 %s477_s10, 4  ;;  %s383_s11 = int_to_ptr.vmem [resolvable:$false] %s382_s11 }
  0x1d   : > { %p380_p3 = pnand %p378_p2, %p366_p1  ;;  %s384_s0 = scalar_lea.vmem %s383_s11, 512 }
  0x1e   : > { %p385_p6 = scmp.lt.s32.totalorder %s122_s6, %s383_s11  ;;  %p386_p7 = scmp.lt.s32.totalorder %s384_s0, %s377_s9 }
  0x1f   : > { %p381_p5 = pneg %p380_p3 }
  0x20   : > { %p387_p10 = por %p386_p7, %p385_p6 }
  0x22   : > { %p388_p4 = pnand %p387_p10, %p381_p5 }
  0x24   : > { %391 = shalt.err (!%p388_p4)
}
  0x25   : > { %s478_s18 = smov 128   ;;  %s479_s20 = smov 8  }
  0x26   : > { %296 = dma.hbm_to_vmem [thread:$0]  (!%p571_p13), %s120_s4, 256, %s122_s6, %s109_s8, %s478_s18, %s478_s18, %s479_s20  }
  0x27   : > { %p129_p12 = scmp.lt.s32.totalorder %s474_s17, 4 }
  0x29   : > { %p130_p1 = pnand %p279_p0, %p129_p12 }
  0x2a   : > { %s584_s21 = sand.u32 (!%p130_p1), 1, %s458_s13  }
  0x2b   : > { %133 = sbr.rel (%p130_p1) target bundleno = 74 (0x4a), region = 24  ;;  %s280_s22 = sshll.u32 (!%p130_p1), %s584_s21, 4 }
  0x2c   : > { %s136_s27 = scalar_lea.sflag (!%p130_p1), [#allocation5], %s584_s21  ;;  %s139_s28 = scalar_lea.vmem (!%p130_p1), [#allocation4], %s280_s22 }
  0x30   : > { %445 = dma.done.wait (%p548_p8), %s136_s27, 256  }
  0x31   : > { %447 = vsyncadd (%p548_p8), %s136_s27, 4294967040  ;;  %s162_s29 = sld [smem:[#allocation3 + %s466_s15]]  ;;  %s157_s30 = scalar_lea.vmem [#allocation7], %s280_s22  ;;  %v160_v0 = vld [vmem:[%s139_s28] sm:$0xff]  ;;  %vm166_vm0 = vcmask 130048   ;;  %v161_v2 = vld [vmem:[%s139_s28 + $0x8] sm:$0xff] }
  0x32   : > { %s185_s3 = sshll.u32 %s157_s30, 4  ;;  %s288_s4 = sshll.u32 %s466_s15, 8  ;;  %s594_s3 = int_to_ptr.vmem [resolvable:$true] %s185_s3 }
  0x33   : > { %s599_s6 = scalar_lea.hbm %s648_s2, %s288_s4  ;;  %s170_s7 = scalar_lea.sflag [#allocation6], %s584_s21 }
  0x34   : > { %s392_s15 = scalar_lea.vmem %s594_s3, 256  ;;  %s480_s8 = smov [#allocation7]  }
  0x35   : > { %p393_p8 = scmp.ne.s32.totalorder %s594_s3, %s392_s15  ;;  %s396_s9 = sshll.u32 %s480_s8, 4  ;;  %s397_s9 = int_to_ptr.vmem [resolvable:$false] %s396_s9 }
  0x36   : > { %s398_s10 = scalar_lea.vmem %s397_s9, 512  ;;  %p399_p2 = scmp.lt.s32.totalorder %s594_s3, %s397_s9 }
  0x37   : > { %v163_v1 = vstv %s162_s29  ;;  %p394_p13 = pnand %p393_p8, %p552_p9  ;;  %p400_p3 = scmp.lt.s32.totalorder %s398_s10, %s392_s15 }
  0x38   : > { %v164_v3 = vmul.f32 %v163_v1, %v160_v0  ;;  %v165_v4 = vmul.f32 %v163_v1, %v161_v2 }
  0x39   : > { %p395_p0 = pneg %p394_p13  ;;  %p401_p5 = por %p400_p3, %p399_p2 }
  0x3a   : > { %167 = vst.msk [vmem:[%s157_s30] sm:$0xff] %vm166_vm0, %v164_v3  ;;  %168 = vst.msk [vmem:[%s157_s30 + $0x8] sm:$0xff] %vm166_vm0, %v165_v4 }
  0x3b   : > { %p402_p6 = pnand %p401_p5, %p395_p0 }
  0x3d   : > { %405 = shalt.err (!%p402_p6)
}
  0x3e   : > { %s406_s11 = scalar_lea.hbm %s599_s6, 256  ;;  %s410_s20 = scalar_lea.hbm %s648_s2, 768 }
  0x3f   : > { %p407_p7 = scmp.ne.s32.totalorder %s599_s6, %s406_s11  ;;  %p411_p12 = scmp.lt.s32.totalorder %s599_s6, %s648_s2 }
  0x40   : > { %p412_p1 = scmp.lt.s32.totalorder %s410_s20, %s406_s11 }
  0x41   : > { %p408_p10 = pnand %p407_p7, %p552_p9 }
  0x42   : > { %p413_p8 = por %p412_p1, %p411_p12 }
  0x43   : > { %p409_p4 = pneg %p408_p10 }
  0x45   : > { %p414_p13 = pnand %p413_p8, %p409_p4 }
  0x47   : > { %417 = shalt.err (!%p414_p13)
}
  0x48   : > { %s481_s28 = smov 128   ;;  %s482_s29 = smov 8  }
  0x49   : > { %291 = dma.vmem_to_hbm [thread:$0]  (%p552_p9), %s594_s3, 256, %s599_s6, %s170_s7, %s481_s28, %s481_s28, %s482_s29  }
  0x4a PF: > { %p302_p0 = scmp.ge.s32.totalorder %s474_s17, 2  ;;  %s200_s30 = sand.u32 1, %s454_s12  }
  0x4b   : > { %s201_s4 = scalar_lea.sflag [#allocation6], %s200_s30 }
  0x4c   : > { %p298_p2 = pnand %p302_p0, %p559_p11 }
  0x4e   : > { %p299_p3 = pneg %p298_p2 }
  0x50   : > { %449 = dma.done.wait (%p299_p3), %s201_s4, 256  }
  0x51   : > { %451 = vsyncadd (%p299_p3), %s201_s4, 4294967040  ;;  %s22_s17 = sadd.s32 1, %s474_s17   ;;  %s654_s12 = smov %s458_s13 }
  0x52   : > { %p19_p5 = scmp.ge.s32.totalorder %s22_s17, 5   ;;  %s655_s13 = smov %s462_s14 }
  0x53   : > { %s656_s14 = smov %s557_s25  ;;  %s657_s15 = smov %s470_s16 }
  0x54   : > { %s658_s16 = smov %s660_s19  ;;  %21 = sbr.rel (!%p19_p5) target bundleno = 11 (0xb), region = 69 }
  0x59   :  { %206 = vsyncpa [#allocation5], 1 }
  0x5a   :  { %208 = vsyncpa [#allocation5 + $0x1], 1 }
  0x5b   :  { %209 = vsyncpa [#allocation6], 1 }
  0x5c   :  { %211 = vsyncpa [#allocation6 + $0x1], 1 }

</bundles_post_ra>
